<compile_context>
chip_gen: v6e
topology: v6e:2x2x1
jax: 0.10.0
libtpu: 0.0.40
codegen_flags: <defaults>
</compile_context>

<pallas_src>
import functools

import jax
import jax.numpy as jnp
from jax.experimental import pallas as pl
from jax.experimental.pallas import tpu as pltpu

# ----------------------------- configuration -----------------------------
B = 2                 # demo batch
OBS_DIM = 16          # env.observation_space.shape == (16,)
NUM_ACTIONS = 4       # env.action_space.n
HIDDEN = 32           # args['hidden_neurons']
SPLIT = True          # args['split_hidden_layer']
FC = HIDDEN // 2 if SPLIT else HIDDEN

OBS_HIGH = 1.0        # np.mean(env.observation_space.high)
OBS_LOW = -1.0        # np.mean(env.observation_space.low)

# hardware-friendly padded sizes
H_PAD = 128                 # hidden padded to one full lane tile
A_PAD = 128                 # output lanes padded -> unmasked vector stores
TILE_B = 8                  # batch tile (multiple of 8 sublanes)
W_ROWS = OBS_DIM + H_PAD    # rows in the packed weight slab (16 + 128 = 144)


# ----------------------- deterministic orthogonal init -------------------
def orthogonal(key, shape, gain):
    """torch.nn.init.orthogonal_-style init (deterministic via PRNGKey)."""
    rows, cols = shape
    n, m = max(rows, cols), min(rows, cols)
    a = jax.random.normal(key, (n, m), dtype=jnp.float32)
    q, r = jnp.linalg.qr(a)
    q = q * jnp.sign(jnp.diag(r))          # make decomposition unique
    q = q[:n, :m]
    if rows < cols:
        q = q.T
    return gain * q[:rows, :cols]


def make_params(key):
    gain = jnp.sqrt(2.0)  # nn.init.calculate_gain('relu')
    k1, k2, k3 = jax.random.split(key, 3)
    # PyTorch Linear stores (out, in); transpose to (in, out) for the kernel.
    w1 = orthogonal(k1, (HIDDEN, OBS_DIM), gain).T          # (OBS_DIM, HIDDEN)
    b1 = jnp.zeros((1, HIDDEN), jnp.float32)
    wa = orthogonal(k2, (NUM_ACTIONS, FC), gain).T          # (FC, NUM_ACTIONS)
    ba = jnp.zeros((1, NUM_ACTIONS), jnp.float32)
    wv = orthogonal(k3, (1, FC), gain).T                    # (FC, 1)
    bv = jnp.zeros((1, 1), jnp.float32)
    return w1, b1, wa, ba, wv, bv


# -------------------- host-side algebraic folding / packing ---------------
def pack_params(w1, b1, wa, ba, wv, bv):
    """Fold normalization + dueling head and pack into 2 lane-dense slabs."""
    s = 1.0 / (OBS_HIGH - OBS_LOW)
    c = -OBS_LOW / (OBS_HIGH - OBS_LOW)

    # layer 1 with normalization folded in: relu(x @ w1f + b1f)
    w1f = s * w1                                           # (OBS_DIM, HIDDEN)
    b1f = b1.reshape(-1) + c * jnp.sum(w1, axis=0)         # (HIDDEN,)

    # dueling head collapsed into one matmul: h @ w_head + b_head
    wa_c = wa - jnp.mean(wa, axis=1, keepdims=True)        # (FC, A)
    wv_t = jnp.tile(wv, (1, NUM_ACTIONS))                  # (FC, A)
    if SPLIT:
        w_head = jnp.concatenate([wa_c, wv_t], axis=0)     # (HIDDEN, A)
    else:
        w_head = wa_c + wv_t                               # (HIDDEN, A)
    b_head = ba.reshape(-1) - jnp.mean(ba) + bv.reshape(-1)[0]   # (A,)

    # pack into one (W_ROWS, 128) weight slab + one (8, 128) bias slab
    w1_pad = jnp.zeros((OBS_DIM, H_PAD), jnp.float32).at[:, :HIDDEN].set(w1f)
    w2_pad = jnp.zeros((H_PAD, A_PAD), jnp.float32).at[:HIDDEN, :NUM_ACTIONS].set(w_head)
    w_slab = jnp.concatenate([w1_pad, w2_pad], axis=0)     # (144, 128)

    b_slab = jnp.zeros((8, A_PAD), jnp.float32)
    b_slab = b_slab.at[0, :HIDDEN].set(b1f)
    b_slab = b_slab.at[1, :NUM_ACTIONS].set(b_head)
    return w_slab, b_slab


# ------------------------------ Pallas kernel -----------------------------
def dueling_dqn_kernel(x_ref, w_ref, b_ref, out_ref):
    # static, tile-aligned slices of the packed weight slab (sublane offsets
    # 0 and 16 are both multiples of 8)
    w1 = w_ref[0:OBS_DIM, :]                 # (OBS_DIM, 128)
    w2 = w_ref[OBS_DIM:OBS_DIM + H_PAD, :]   # (128, 128)
    b1 = b_ref[0:1, :]                       # (1, 128)
    b2 = b_ref[1:2, :]                       # (1, 128)

    h = jnp.dot(x_ref[...], w1, preferred_element_type=jnp.float32)
    h = jnp.maximum(h + b1, 0.0)             # (TILE_B, 128); padded cols stay 0

    out = jnp.dot(h, w2, preferred_element_type=jnp.float32) + b2
    out_ref[...] = out.astype(out_ref.dtype)  # lane-dense (TILE_B, 128) store


@functools.partial(jax.jit, static_argnames=("tile_b",))
def dueling_dqn_forward(x, w_slab, b_slab, *, tile_b=TILE_B):
    b = x.shape[0]
    b_pad = ((b + tile_b - 1) // tile_b) * tile_b
    if b_pad != b:
        x = jnp.pad(x, ((0, b_pad - b), (0, 0)))

    grid = (b_pad // tile_b,)
    out = pl.pallas_call(
        dueling_dqn_kernel,
        out_shape=jax.ShapeDtypeStruct((b_pad, A_PAD), jnp.float32),
        grid=grid,
        in_specs=[
            pl.BlockSpec((tile_b, OBS_DIM), lambda i: (i, 0)),     # x tile
            pl.BlockSpec((W_ROWS, A_PAD), lambda i: (0, 0)),       # weights (resident)
            pl.BlockSpec((8, A_PAD), lambda i: (0, 0)),            # biases (resident)
        ],
        out_specs=pl.BlockSpec((tile_b, A_PAD), lambda i: (i, 0)),
        compiler_params=pltpu.CompilerParams(
            dimension_semantics=("parallel",)),                    # megacore on v7x
    )(x, w_slab, b_slab)
    return out[:b, :NUM_ACTIONS]


# ------------------------------ reference ---------------------------------
def dueling_dqn_ref(x, w1, b1, wa, ba, wv, bv):
    xn = (x - OBS_LOW) / (OBS_HIGH - OBS_LOW)
    h = jnp.maximum(xn @ w1 + b1, 0.0)
    a_in = h[:, :FC] if SPLIT else h
    v_in = h[:, FC:] if SPLIT else h
    adv = a_in @ wa + ba
    val = v_in @ wv + bv
    return val + adv - adv.mean(axis=1, keepdims=True)


# -------------------------------- main -------------------------------------
if __name__ == "__main__":
    key = jax.random.PRNGKey(0)
    k_x, k_p, k_x2 = jax.random.split(key, 3)
    params = make_params(k_p)
    w_slab, b_slab = pack_params(*params)

    # small demo batch (B = 2, padded internally to 8 sublanes)
    x = jax.random.uniform(k_x, (B, OBS_DIM), jnp.float32,
                           minval=OBS_LOW, maxval=OBS_HIGH)
    out = dueling_dqn_forward(x, w_slab, b_slab)
    jax.block_until_ready(out)
    ref = dueling_dqn_ref(x, *params)
    assert out.shape == (B, NUM_ACTIONS)
    assert jnp.allclose(out, ref, atol=1e-4, rtol=1e-4), (out, ref)

    # larger batch exercises the real grid axis (weights stay VMEM-resident)
    x_big = jax.random.uniform(k_x2, (64, OBS_DIM), jnp.float32,
                               minval=OBS_LOW, maxval=OBS_HIGH)
    out_big = dueling_dqn_forward(x_big, w_slab, b_slab)
    jax.block_until_ready(out_big)
    ref_big = dueling_dqn_ref(x_big, *params)
    assert out_big.shape == (64, NUM_ACTIONS)
    assert jnp.allclose(out_big, ref_big, atol=1e-4, rtol=1e-4)

    print("KERNEL_OK")
</pallas_src>

<mosaic_0001>
module attributes {stable_mosaic.version = 11 : i64} {
  func.func @dueling_dqn_kernel(%arg0: i32, %arg1: memref<8x16xf32, #tpu.memory_space<vmem>>, %arg2: memref<144x128xf32, #tpu.memory_space<vmem>>, %arg3: memref<8x128xf32, #tpu.memory_space<vmem>>, %arg4: memref<8x128xf32, #tpu.memory_space<vmem>>) attributes {dimension_semantics = [#tpu.dimension_semantics<parallel>], iteration_bounds = array<i64: 1>, scalar_prefetch = 0 : i64, scratch_operands = 0 : i64, tpu.core_type = #tpu.core_type<tc>, window_params = [{transform_indices = @transform_0, window_bounds = array<i64: 8, 16>}, {pipeline_mode = #tpu.pipeline_mode<synchronous>, transform_indices = @transform_1, window_bounds = array<i64: 144, 128>}, {pipeline_mode = #tpu.pipeline_mode<synchronous>, transform_indices = @transform_2, window_bounds = array<i64: 8, 128>}, {transform_indices = @transform_3, window_bounds = array<i64: 8, 128>}]} {
    %c0 = arith.constant 0 : index
    %c0_0 = arith.constant 0 : index
    %0 = vector.load %arg2[%c0, %c0_0] : memref<144x128xf32, #tpu.memory_space<vmem>>, vector<16x128xf32>
    %c16 = arith.constant 16 : index
    %c0_1 = arith.constant 0 : index
    %1 = vector.load %arg2[%c16, %c0_1] : memref<144x128xf32, #tpu.memory_space<vmem>>, vector<128x128xf32>
    %c0_2 = arith.constant 0 : index
    %c0_3 = arith.constant 0 : index
    %2 = vector.load %arg3[%c0_2, %c0_3] : memref<8x128xf32, #tpu.memory_space<vmem>>, vector<1x128xf32>
    %c1 = arith.constant 1 : index
    %c0_4 = arith.constant 0 : index
    %3 = vector.load %arg3[%c1, %c0_4] : memref<8x128xf32, #tpu.memory_space<vmem>>, vector<1x128xf32>
    %c0_5 = arith.constant 0 : index
    %c0_6 = arith.constant 0 : index
    %4 = vector.load %arg1[%c0_5, %c0_6] : memref<8x16xf32, #tpu.memory_space<vmem>>, vector<8x16xf32>
    %cst = arith.constant dense<0.000000e+00> : vector<8x128xf32>
    %5 = tpu.matmul %4, %0, %cst {dimension_numbers = #tpu.dot_dimension_numbers<[1], [0], [0], [1], [0, 0, 1, 1], [], []>} : vector<8x16xf32>, vector<16x128xf32>, vector<8x128xf32> -> vector<8x128xf32>
    %6 = vector.broadcast %2 : vector<1x128xf32> to vector<8x128xf32>
    %7 = arith.addf %5, %6 : vector<8x128xf32>
    %cst_7 = arith.constant 0.000000e+00 : f32
    %8 = vector.broadcast %cst_7 : f32 to vector<8x128xf32>
    %9 = arith.maximumf %7, %8 : vector<8x128xf32>
    %cst_8 = arith.constant dense<0.000000e+00> : vector<8x128xf32>
    %10 = tpu.matmul %9, %1, %cst_8 {dimension_numbers = #tpu.dot_dimension_numbers<[1], [0], [0], [1], [0, 0, 1, 1], [], []>} : vector<8x128xf32>, vector<128x128xf32>, vector<8x128xf32> -> vector<8x128xf32>
    %11 = vector.broadcast %3 : vector<1x128xf32> to vector<8x128xf32>
    %12 = arith.addf %10, %11 : vector<8x128xf32>
    %c0_9 = arith.constant 0 : index
    %c0_10 = arith.constant 0 : index
    %13 = vector.load %arg4[%c0_9, %c0_10] : memref<8x128xf32, #tpu.memory_space<vmem>>, vector<8x128xf32>
    tpu.vector_store %arg4[%c0_9, %c0_10], %12 {strides = array<i32>} : memref<8x128xf32, #tpu.memory_space<vmem>>, vector<8x128xf32>,
    return
  }
  func.func @transform_0(%arg0: i32) -> (i32, i32) {
    %c0_i32 = arith.constant 0 : i32
    %c0_i32_0 = arith.constant 0 : i32
    return %arg0, %c0_i32 : i32, i32
  }
  func.func @transform_1(%arg0: i32) -> (i32, i32) {
    %c0_i32 = arith.constant 0 : i32
    %c0_i32_0 = arith.constant 0 : i32
    %c0_i32_1 = arith.constant 0 : i32
    return %c0_i32, %c0_i32_0 : i32, i32
  }
  func.func @transform_2(%arg0: i32) -> (i32, i32) {
    %c0_i32 = arith.constant 0 : i32
    %c0_i32_0 = arith.constant 0 : i32
    %c0_i32_1 = arith.constant 0 : i32
    return %c0_i32, %c0_i32_0 : i32, i32
  }
  func.func @transform_3(%arg0: i32) -> (i32, i32) {
    %c0_i32 = arith.constant 0 : i32
    %c0_i32_0 = arith.constant 0 : i32
    return %arg0, %c0_i32 : i32, i32
  }
}

</mosaic_0001>

<bundles_post_ra>
// kernel: dueling_dqn_forward.1
= control target key start
LH: loop header
LB: loop body
LE: loop exit
PB: predicated region body
PF: predicated region fallthrough
CT: control target
= control target key end

     0   :  { %8 = vsyncpa [#allocation3], 0  ;;  %s300_s12 = smov [#allocation2]   ;;  %s340_s0 = inlined_call_operand.vmem [shape: f32[8,16], index: 0, kind: input, shape index: {}]   ;;  %s341_s1 = inlined_call_operand.hbm [shape: f32[144,128], index: 1, kind: input, shape index: {}]   ;;  %s342_s2 = inlined_call_operand.vmem [shape: f32[8,128], index: 2, kind: input, shape index: {}]   ;;  %s343_s3 = inlined_call_operand.vmem [shape: f32[8,128], index: 3, kind: output, shape index: {}]  }
   0x1   :  { %s16_s13 = sshll.u32 %s300_s12, 4  ;;  %s17_s13 = int_to_ptr.vmem [resolvable:$true] %s16_s13 }
   0x2   :  { %s286_s14 = scalar_lea.vmem %s17_s13, 2304  ;;  %p291_p1 = scmp.lt.s32.totalorder %s17_s13, %s17_s13 }
   0x3   :  { %p287_p0 = scmp.ne.s32.totalorder %s17_s13, %s286_s14  ;;  %p292_p2 = scmp.lt.s32.totalorder %s286_s14, %s286_s14 }
   0x5   :  { %p293_p3 = por %p292_p2, %p291_p1 }
   0x7   :  { %p294_p4 = pnand %p293_p3, %p287_p0 }
   0x9   :  { %297 = shalt.err (!%p294_p4)
}
   0xa   :  { %s301_s15 = smov 128   ;;  %s302_s16 = smov 8  }
   0xb   :  { %22 = dma.hbm_to_vmem [thread:$0]  %s341_s1, 2304, %s17_s13, [#allocation3], %s301_s15, %s301_s15, %s302_s16  }
   0xc   :  { %298 = dma.done.wait [#allocation3], 2304  }
   0xd   :  { %299 = vsyncadd [#allocation3], 4294964992  ;;  %v303_v0 = vmov 0.0   ;;  %vm304_vm0 = vmmov 0   ;;  %v29_v1 = vld [vmem:[#allocation2 + $0x8] sm:$0xff]  ;;  %v28_v2 = vld [vmem:[#allocation2] sm:$0xff] }
   0xe   :  { %231 = vmatprep.subr.mxu0 %v303_v0  ;;  %235 = vmatprep.mubr.msk.f32.mxu0 %vm304_vm0, %v303_v0  ;;  %v48_v3 = vld [vmem:[%s340_s0] sm:$0xff]  ;;  %vm53_vm1 = vcmask 130048   ;;  %v45_v4 = vld [vmem:[#allocation2 + $0x88] sm:$0xff]  ;;  %v43_v6 = vld [vmem:[#allocation2 + $0x78] sm:$0xff] }
   0xf   :  { %238 = vmatprep.subr.mxu1 %v303_v0  ;;  %270 = vmatprep.mubr.msk.f32.mxu1 %vm304_vm0, %v303_v0  ;;  %v44_v5 = vld [vmem:[#allocation2 + $0x80] sm:$0xff]  ;;  %v42_v7 = vld [vmem:[#allocation2 + $0x70] sm:$0xff]  ;;  %v41_v8 = vld [vmem:[#allocation2 + $0x68] sm:$0xff] }
  0x10   :  { %232 = vmatpush3.msra.mxu0 %v29_v1  ;;  %239 = vmatpush3.msra.mxu1 %v45_v4  ;;  %v40_v9 = vld [vmem:[#allocation2 + $0x60] sm:$0xff]  ;;  %v39_v10 = vld [vmem:[#allocation2 + $0x58] sm:$0xff]  ;;  %v38_v11 = vld [vmem:[#allocation2 + $0x50] sm:$0xff] }
  0x11   :  { %233 = vmatprep.subr.mxu0 %v303_v0  ;;  %240 = vmatprep.subr.mxu1 %v303_v0  ;;  %v37_v12 = vld [vmem:[#allocation2 + $0x48] sm:$0xff]  ;;  %v36_v13 = vld [vmem:[#allocation2 + $0x40] sm:$0xff]  ;;  %v35_v14 = vld [vmem:[#allocation2 + $0x38] sm:$0xff] }
  0x12   :  { %234 = vmatpush3.msra.mxu0 %v28_v2  ;;  %241 = vmatpush3.msra.mxu1 %v44_v5  ;;  %v34_v15 = vld [vmem:[#allocation2 + $0x30] sm:$0xff]  ;;  %v33_v16 = vld [vmem:[#allocation2 + $0x28] sm:$0xff]  ;;  %v32_v17 = vld [vmem:[#allocation2 + $0x20] sm:$0xff] }
  0x13   :  { %236 = vmatmul.mubr.msk.f32.vlgmr.msra.gmra.mxu0 %vm53_vm1, %v48_v3  ;;  %242 = vmatprep.subr.mxu1 %v303_v0  ;;  %v31_v18 = vld [vmem:[#allocation2 + $0x18] sm:$0xff]  ;;  %v30_v19 = vld [vmem:[#allocation2 + $0x10] sm:$0xff]  ;;  %v208_v20 = vld [vmem:[%s342_s2] ss:$0 sm:$0xff] }
  0x14   :  { %243 = vmatpush3.msra.mxu1 %v43_v6  ;;  %v210_v25 = vld [vmem:[%s342_s2 + $0x1] ss:$0 sm:$0xff] }
  0x15   :  { %244 = vmatprep.subr.mxu1 %v303_v0 }
  0x16   :  { %245 = vmatpush3.msra.mxu1 %v42_v7 }
  0x17   :  { %246 = vmatprep.subr.mxu1 %v303_v0 }
  0x18   :  { %247 = vmatpush3.msra.mxu1 %v41_v8 }
  0x19   :  { %248 = vmatprep.subr.mxu1 %v303_v0 }
  0x1a   :  { %249 = vmatpush3.msra.mxu1 %v40_v9 }
  0x1b   :  { %250 = vmatprep.subr.mxu1 %v303_v0 }
  0x1c   :  { %251 = vmatpush3.msra.mxu1 %v39_v10 }
  0x1d   :  { %252 = vmatprep.subr.mxu1 %v303_v0 }
  0x1e   :  { %253 = vmatpush3.msra.mxu1 %v38_v11 }
  0x1f   :  { %254 = vmatprep.subr.mxu1 %v303_v0 }
  0x20   :  { %255 = vmatpush3.msra.mxu1 %v37_v12 }
  0x21   :  { %256 = vmatprep.subr.mxu1 %v303_v0 }
  0x22   :  { %257 = vmatpush3.msra.mxu1 %v36_v13 }
  0x23   :  { %258 = vmatprep.subr.mxu1 %v303_v0 }
  0x24   :  { %259 = vmatpush3.msra.mxu1 %v35_v14 }
  0x25   :  { %260 = vmatprep.subr.mxu1 %v303_v0 }
  0x26   :  { %261 = vmatpush3.msra.mxu1 %v34_v15 }
  0x27   :  { %262 = vmatprep.subr.mxu1 %v303_v0 }
  0x28   :  { %263 = vmatpush3.msra.mxu1 %v33_v16 }
  0x29   :  { %264 = vmatprep.subr.mxu1 %v303_v0 }
  0x2a   :  { %265 = vmatpush3.msra.mxu1 %v32_v17 }
  0x2b   :  { %266 = vmatprep.subr.mxu1 %v303_v0 }
  0x2c   :  { %267 = vmatpush3.msra.mxu1 %v31_v18 }
  0x2d   :  { %268 = vmatprep.subr.mxu1 %v303_v0 }
  0x2e   :  { %269 = vmatpush3.msra.mxu1 %v30_v19 }
  0xd3   :  { %v123_v21 = vpop.f32.mrf.mxu0 }
  0xd4   :  { %v124_v22 = vadd.f32 %v208_v20, %v123_v21 }
  0xd5   :  { %v237_v23 = vpop.f32.mrf.mxu0 }
  0xd6   :  { %v127_v24 = vmax.f32 %v124_v22, 0.0 }
  0xd8   :  { %271 = vmatmul.mubr.f32.vlgmr.msra.gmra.mxu1 %v127_v24 }
 0x198   :  { %v198_v26 = vpop.f32.mrf.mxu1 }
 0x199   :  { %v199_v27 = vadd.f32 %v210_v25, %v198_v26 }
 0x19a   :  { %v272_v28 = vpop.f32.mrf.mxu1 }
 0x19b   :  { %202 = vst [vmem:[%s343_s3] sm:$0xff] %v199_v27 }
 0x19c   :  { %207 = vsyncpa [#allocation3], 1 }

</bundles_post_ra>
